<compile_context>
chip_gen: v5e
topology: v5e:2x2
jax: 0.10.0
libtpu: 0.0.40
codegen_flags: <defaults>
</compile_context>

<pallas_src>
import jax
import jax.numpy as jnp
from jax import lax
from jax.experimental import pallas as pl
from jax.experimental.pallas import tpu as pltpu

_LANE = 128


def _make_tp_kernel(tile, hw_valid):
    """Builds the streaming true-positive accumulation kernel.

    tile      : pixels per block (static, multiple of 128)
    hw_valid  : true (unpadded) number of pixels per image (static)
    """

    def kernel(x_ref, t_ref, tp_ref, acc_ref):
        # x_ref  : (1, C, tile) f32 logits block
        # t_ref  : (1, 1, tile) i32 label block
        # tp_ref : (1, 1, 128)  f32 per-batch tp output block (same block for all i)
        # acc_ref: (C, tile)    f32 VMEM accumulator scratch
        i = pl.program_id(1)
        nt = pl.num_programs(1)

        @pl.when(i == 0)
        def _init():
            acc_ref[...] = jnp.zeros_like(acc_ref)

        x = x_ref[0]        # (C, tile) f32
        labels = t_ref[0]   # (1, tile) i32

        # Numerically-stable softmax over the channel (sublane) axis.
        m = jnp.max(x, axis=0, keepdims=True)
        e = jnp.exp(x - m)
        denom = jnp.sum(e, axis=0, keepdims=True)
        probas = e / denom

        # one-hot(label) selection fused with the padded-pixel mask:
        # contribution of pixel p is probas[label[p], p] iff p is a real pixel.
        cls = lax.broadcasted_iota(jnp.int32, x.shape, 0)              # (C, tile)
        col = lax.broadcasted_iota(jnp.int32, (1, tile), 1) + i * tile  # (1, tile)
        hit = (cls == labels) & (col < hw_valid)                        # (C, tile)

        acc_ref[...] += jnp.where(hit, probas, 0.0)

        @pl.when(i == nt - 1)
        def _finalize():
            tp = jnp.sum(acc_ref[...])
            tp_ref[...] = jnp.full((1, 1, _LANE), tp, dtype=jnp.float32)

    return kernel


def _choose_tile(C, hw, target_block_bytes=2 * 1024 * 1024):
    """Pixel-tile width: ~target_block_bytes of logits per block, multiple of 128."""
    hw_ceil = -(-hw // _LANE) * _LANE
    budget_lanes = target_block_bytes // (C * 4)
    tile = max(_LANE, (budget_lanes // _LANE) * _LANE)
    return min(tile, hw_ceil)


def focal_tversky_loss(logits, target, alpha=0.7, beta=0.3, gamma=1.33,
                       smooth=1.0):
    """logits: (N, C, H, W) float ; target: (N, 1, H, W) integer class ids."""
    N, C, H, W = logits.shape
    hw = H * W

    tile = _choose_tile(C, hw)
    hw_pad = -(-hw // tile) * tile
    nt = hw_pad // tile

    # Free reshapes (no HBM transpose of the dominant tensor).
    x = logits.reshape(N, C, hw).astype(jnp.float32)
    t = target.reshape(N, 1, hw).astype(jnp.int32)
    if hw_pad != hw:
        x = jnp.pad(x, ((0, 0), (0, 0), (0, hw_pad - hw)))
        t = jnp.pad(t, ((0, 0), (0, 0), (0, hw_pad - hw)))

    kernel = _make_tp_kernel(tile, hw)

    partials = pl.pallas_call(
        kernel,
        out_shape=jax.ShapeDtypeStruct((N, 1, _LANE), jnp.float32),
        grid_spec=pltpu.PrefetchScalarGridSpec(
            num_scalar_prefetch=0,
            grid=(N, nt),
            in_specs=[
                pl.BlockSpec((1, C, tile), lambda n, i: (n, 0, i)),
                pl.BlockSpec((1, 1, tile), lambda n, i: (n, 0, i)),
            ],
            out_specs=pl.BlockSpec((1, 1, _LANE), lambda n, i: (n, 0, 0)),
            scratch_shapes=[pltpu.VMEM((C, tile), jnp.float32)],
        ),
        compiler_params=pltpu.CompilerParams(
            dimension_semantics=("parallel", "arbitrary"),
            vmem_limit_bytes=32 * 1024 * 1024,
        ),
    )(x, t)

    # Scalar epilogue (exact identities: softmax rows and one-hot rows sum to 1,
    # so fn = fp = N*H*W - tp).
    tp = jnp.sum(partials[:, 0, 0])
    total = jnp.float32(N * hw)
    fn = total - tp
    fp = total - tp
    numerator = tp + smooth
    denominator = tp + alpha * fp + beta * fn + smooth
    ti = numerator / denominator
    # The PyTorch class loop adds n_classes identical terms then divides by
    # n_classes, which collapses to a single term.
    return jnp.power(1.0 - ti, 1.0 / gamma)


def _reference(logits, target, alpha=0.7, beta=0.3, gamma=1.33, smooth=1.0):
    # Pure-JAX reference mirroring the PyTorch forward exactly (no identities).
    N, C, H, W = logits.shape
    probas = jax.nn.softmax(logits.astype(jnp.float32), axis=1)
    one_hot = jax.nn.one_hot(target[:, 0], C, dtype=jnp.float32)   # (N,H,W,C)
    one_hot = jnp.transpose(one_hot, (0, 3, 1, 2))                  # (N,C,H,W)
    tp = jnp.sum(one_hot * probas)
    fn = jnp.sum(one_hot * (1.0 - probas))
    fp = jnp.sum((1.0 - one_hot) * probas)
    ti = (tp + smooth) / (tp + alpha * fp + beta * fn + smooth)
    return (1.0 - ti) ** (1.0 / gamma)


if __name__ == "__main__":
    key = jax.random.PRNGKey(0)
    k1, k2 = jax.random.split(key)

    N, C, H, W = 2, 4, 16, 16
    logits = jax.random.normal(k1, (N, C, H, W), dtype=jnp.float32)
    target = jax.random.randint(k2, (N, 1, H, W), 0, C, dtype=jnp.int32)

    loss = focal_tversky_loss(logits, target)
    loss = jax.block_until_ready(loss)

    ref = _reference(logits, target)
    assert jnp.allclose(loss, ref, rtol=1e-5, atol=1e-5), (loss, ref)

    print("KERNEL_OK")
</pallas_src>

<mosaic_0001>
module attributes {stable_mosaic.version = 11 : i64} {
  func.func @kernel(%arg0: i32, %arg1: i32, %arg2: memref<1x4x256xf32, #tpu.memory_space<vmem>>, %arg3: memref<1x1x256xi32, #tpu.memory_space<vmem>>, %arg4: memref<1x1x128xf32, #tpu.memory_space<vmem>>, %arg5: memref<4x256xf32, #tpu.memory_space<vmem>>) attributes {dimension_semantics = [#tpu.dimension_semantics<parallel>, #tpu.dimension_semantics<arbitrary>], iteration_bounds = array<i64: 2, 1>, scalar_prefetch = 0 : i64, scratch_operands = 1 : i64, tpu.core_type = #tpu.core_type<tc>, window_params = [{transform_indices = @transform_0, window_bounds = array<i64: 1, 4, 256>}, {transform_indices = @transform_1, window_bounds = array<i64: 1, 1, 256>}, {transform_indices = @transform_2, window_bounds = array<i64: 1, 1, 128>}]} {
    %c0_i32 = arith.constant 0 : i32
    %0 = arith.cmpi eq, %arg1, %c0_i32 : i32
    %1 = arith.extui %0 : i1 to i32
    %c0_i32_0 = arith.constant 0 : i32
    %2 = arith.cmpi ne, %1, %c0_i32_0 : i32
    scf.if %2 {
      %cst_15 = arith.constant 0.000000e+00 : f32
      %35 = vector.broadcast %cst_15 : f32 to vector<4x256xf32>
      %c0_16 = arith.constant 0 : index
      %c0_17 = arith.constant 0 : index
      %36 = vector.load %arg5[%c0_16, %c0_17] : memref<4x256xf32, #tpu.memory_space<vmem>>, vector<4x256xf32>
      tpu.vector_store %arg5[%c0_16, %c0_17], %35 {strides = array<i32>} : memref<4x256xf32, #tpu.memory_space<vmem>>, vector<4x256xf32>,
    } else {
    }
    %c0 = arith.constant 0 : index
    %c0_1 = arith.constant 0 : index
    %c0_2 = arith.constant 0 : index
    %3 = vector.load %arg2[%c0, %c0_1, %c0_2] : memref<1x4x256xf32, #tpu.memory_space<vmem>>, vector<1x4x256xf32>
    %4 = vector.shape_cast %3 : vector<1x4x256xf32> to vector<4x256xf32>
    %c0_3 = arith.constant 0 : index
    %c0_4 = arith.constant 0 : index
    %c0_5 = arith.constant 0 : index
    %5 = vector.load %arg3[%c0_3, %c0_4, %c0_5] : memref<1x1x256xi32, #tpu.memory_space<vmem>>, vector<1x1x256xi32>
    %6 = vector.shape_cast %5 : vector<1x1x256xi32> to vector<1x256xi32>
    %cst = arith.constant dense<0xFF800000> : vector<256xf32>
    %7 = vector.multi_reduction <maximumf>, %4, %cst [0] : vector<4x256xf32> to vector<256xf32>
    %8 = vector.shape_cast %7 : vector<256xf32> to vector<1x256xf32>
    %9 = vector.broadcast %8 : vector<1x256xf32> to vector<4x256xf32>
    %10 = arith.subf %4, %9 : vector<4x256xf32>
    %11 = math.exp %10 : vector<4x256xf32>
    %cst_6 = arith.constant dense<0.000000e+00> : vector<256xf32>
    %12 = vector.multi_reduction <add>, %11, %cst_6 [0] : vector<4x256xf32> to vector<256xf32>
    %13 = vector.shape_cast %12 : vector<256xf32> to vector<1x256xf32>
    %14 = vector.broadcast %13 : vector<1x256xf32> to vector<4x256xf32>
    %15 = arith.divf %11, %14 : vector<4x256xf32>
    %16 = tpu.iota {dimensions = array<i32: 0>} : vector<4x256xi32>
    %17 = tpu.iota {dimensions = array<i32: 1>} : vector<1x256xi32>
    %c256_i32 = arith.constant 256 : i32
    %18 = arith.muli %arg1, %c256_i32 : i32
    %19 = vector.broadcast %18 : i32 to vector<1x256xi32>
    %20 = arith.addi %17, %19 : vector<1x256xi32>
    %21 = vector.broadcast %6 : vector<1x256xi32> to vector<4x256xi32>
    %22 = arith.cmpi eq, %16, %21 : vector<4x256xi32>
    %c256_i32_7 = arith.constant 256 : i32
    %23 = vector.broadcast %c256_i32_7 : i32 to vector<1x256xi32>
    %24 = arith.cmpi slt, %20, %23 : vector<1x256xi32>
    %25 = vector.broadcast %24 : vector<1x256xi1> to vector<4x256xi1>
    %26 = arith.andi %22, %25 : vector<4x256xi1>
    %c0_8 = arith.constant 0 : index
    %c0_9 = arith.constant 0 : index
    %27 = vector.load %arg5[%c0_8, %c0_9] : memref<4x256xf32, #tpu.memory_space<vmem>>, vector<4x256xf32>
    %cst_10 = arith.constant 0.000000e+00 : f32
    %28 = vector.broadcast %cst_10 : f32 to vector<4x256xf32>
    %29 = arith.select %26, %15, %28 : vector<4x256xi1>, vector<4x256xf32>
    %30 = arith.addf %27, %29 : vector<4x256xf32>
    %c0_11 = arith.constant 0 : index
    %c0_12 = arith.constant 0 : index
    %31 = vector.load %arg5[%c0_11, %c0_12] : memref<4x256xf32, #tpu.memory_space<vmem>>, vector<4x256xf32>
    tpu.vector_store %arg5[%c0_11, %c0_12], %30 {strides = array<i32>} : memref<4x256xf32, #tpu.memory_space<vmem>>, vector<4x256xf32>,
    %c0_i32_13 = arith.constant 0 : i32
    %32 = arith.cmpi eq, %arg1, %c0_i32_13 : i32
    %33 = arith.extui %32 : i1 to i32
    %c0_i32_14 = arith.constant 0 : i32
    %34 = arith.cmpi ne, %33, %c0_i32_14 : i32
    scf.if %34 {
      %c0_15 = arith.constant 0 : index
      %c0_16 = arith.constant 0 : index
      %35 = vector.load %arg5[%c0_15, %c0_16] : memref<4x256xf32, #tpu.memory_space<vmem>>, vector<4x256xf32>
      %36 = vector.shape_cast %35 : vector<4x256xf32> to vector<1x4x256xf32>
      %cst_17 = arith.constant dense<0.000000e+00> : vector<1xf32>
      %37 = vector.multi_reduction <add>, %36, %cst_17 [1, 2] : vector<1x4x256xf32> to vector<1xf32>
      %38 = vector.shape_cast %37 : vector<1xf32> to vector<1x1x1xf32>
      %39 = vector.extract %38[0, 0, 0] : f32 from vector<1x1x1xf32>
      %40 = vector.broadcast %39 : f32 to vector<1x1x128xf32>
      %c0_18 = arith.constant 0 : index
      %c0_19 = arith.constant 0 : index
      %c0_20 = arith.constant 0 : index
      %41 = vector.load %arg4[%c0_18, %c0_19, %c0_20] : memref<1x1x128xf32, #tpu.memory_space<vmem>>, vector<1x1x128xf32>
      tpu.vector_store %arg4[%c0_18, %c0_19, %c0_20], %40 {strides = array<i32>} : memref<1x1x128xf32, #tpu.memory_space<vmem>>, vector<1x1x128xf32>,
    } else {
    }
    return
  }
  func.func @transform_0(%arg0: i32, %arg1: i32) -> (i32, i32, i32) {
    %c0_i32 = arith.constant 0 : i32
    %c0_i32_0 = arith.constant 0 : i32
    return %arg0, %c0_i32, %arg1 : i32, i32, i32
  }
  func.func @transform_1(%arg0: i32, %arg1: i32) -> (i32, i32, i32) {
    %c0_i32 = arith.constant 0 : i32
    %c0_i32_0 = arith.constant 0 : i32
    return %arg0, %c0_i32, %arg1 : i32, i32, i32
  }
  func.func @transform_2(%arg0: i32, %arg1: i32) -> (i32, i32, i32) {
    %c0_i32 = arith.constant 0 : i32
    %c0_i32_0 = arith.constant 0 : i32
    %c0_i32_1 = arith.constant 0 : i32
    return %arg0, %c0_i32, %c0_i32_0 : i32, i32, i32
  }
}

</mosaic_0001>

<bundles_post_ra>
// kernel: tpu_custom_call.1
= control target key start
LH: loop header
LB: loop body
LE: loop exit
PB: predicated region body
PF: predicated region fallthrough
CT: control target
= control target key end

     0   :  { %7 = vsyncpa [#allocation4], 0  ;;  %s876_s0 = inlined_call_operand.hbm [shape: f32[2,4,256], index: 0, kind: input, shape index: {}]   ;;  %s877_s1 = inlined_call_operand.hbm [shape: s32[2,1,256], index: 1, kind: input, shape index: {}]   ;;  %s878_s2 = inlined_call_operand.hbm [shape: f32[2,1,128], index: 2, kind: output, shape index: {}]  }
   0x1   :  { %9 = vsyncpa [#allocation4 + $0x1], 0 }
   0x2   :  { %10 = vsyncpa [#allocation7], 0 }
   0x3   :  { %12 = vsyncpa [#allocation7 + $0x1], 0 }
   0x4   :  { %13 = vsyncpa [#allocation5], 0 }
   0x5   :  { %15 = vsyncpa [#allocation5 + $0x1], 0  ;;  %s725_s9 = smov 0   ;;  %s727_s10 = smov 0  }
   0x6   :  { %s729_s11 = smov 0   ;;  %s731_s12 = smov 0  }
   0x7   :  { %s733_s13 = smov 0   ;;  %s735_s14 = smov 0  }
   0x8 LB: > { %s474_s15 = sadd.s32 4294967295, %s708_s14   ;;  %s475_s16 = sadd.s32 4294967294, %s708_s14   ;;  %s708_s14 = sphi %s735_s14, %s21_s14   ;;  %s704_s13 = sphi %s733_s13, %s888_s13   ;;  %s700_s12 = sphi %s731_s12, %s887_s12   ;;  %s696_s11 = sphi %s729_s11, %s886_s11   ;;  %s692_s10 = sphi %s727_s10, %s885_s10   ;;  %s688_s9 = sphi %s725_s9, %s884_s9  }
   0x9   : > { %s33_s17 = sadd.s32 1, %s704_s13  ;;  %s42_s18 = sadd.s32 1, %s696_s11 }
   0xa   : > { %p35_p0 = scmp.ge.s32.totalorder %s33_s17, 2  ;;  %p49_p1 = scmp.ne.s32.totalorder %s696_s11, %s692_s10 }
   0xb   : > { %p50_p2 = scmp.eq.s32.totalorder %s708_s14, 0  ;;  %p55_p3 = scmp.ne.s32.totalorder %s692_s10, %s688_s9 }
   0xc   : > { %s890_s17 = smov (%p35_p0, %s33_s17), 0  ;;  %p56_p5 = scmp.eq.s32.totalorder %s474_s15, 0 }
   0xd   : > { %p766_p4 = por %p50_p2, %p49_p1  ;;  %s37_s20 = ssub.s32 %s704_s13, %s890_s17 }
   0xe   : > { %p107_p6 = scmp.eq.s32.totalorder %s474_s15, 1  ;;  %p40_p7 = scmp.eq.s32.totalorder %s37_s20, 0 }
   0xf   : > { %p772_p8 = por %p56_p5, %p55_p3  ;;  %p113_p10 = scmp.eq.s32.totalorder %s475_s16, 1 }
  0x10   : > { %p776_p9 = por %p107_p6, %p49_p1  ;;  %p477_p12 = scmp.ge.s32.totalorder %s708_s14, 2 }
  0x11   : > { %s781_s23 = scalar_select %p40_p7, %s696_s11, %s42_s18  }
  0x12   : > { %p783_p11 = por %p113_p10, %p55_p3  ;;  %p508_p13 = scmp.lt.s32.totalorder %s708_s14, 2 }
  0x13   : > { %s133_s25 = sand.u32 1, %s696_s11   ;;  %s488_s27 = sshll.u32 %s704_s13, 3 }
  0x14   : > { %s478_s26 = sshll.u32 %s133_s25, 3  ;;  %s144_s30 = scalar_lea.hbm %s876_s0, %s488_s27 }
  0x15   : > { %s137_s3 = scalar_lea.vmem [#allocation3], %s478_s26  ;;  %s146_s5 = sshll.u32 %s144_s30, 4  ;;  %s147_s5 = int_to_ptr.hbm [resolvable:$true] %s146_s5 }
  0x16   : > { %s148_s4 = sshll.u32 %s137_s3, 4  ;;  %p796_p0 = pnand %p508_p13, %p766_p4  ;;  %s149_s4 = int_to_ptr.vmem [resolvable:$true] %s148_s4 }
  0x17   : > { %p483_p1 = scmp.ge.s32.totalorder %s708_s14, 1  ;;  %p174_p2 = scmp.lt.s32.totalorder %s708_s14, 3 }
  0x18   : > { %s134_s7 = scalar_lea.sflag [#allocation4], %s133_s25  ;;  %s481_s8 = sshll.u32 %s133_s25, 1 }
  0x19   : > { %500 = dma.hbm_to_vmem [thread:$0]  (!%p796_p0), %s147_s5, 128, %s149_s4, %s134_s7  }
  0x1a   : > { %p175_p3 = pnand %p483_p1, %p174_p2  ;;  %s482_s15 = sshll.u32 %s704_s13, 1 }
  0x1b   : > { %s165_s20 = scalar_lea.hbm %s877_s1, %s482_s15  ;;  %s159_s26 = scalar_lea.vmem [#allocation6], %s481_s8 }
  0x1c   : > { %s169_s19 = sshll.u32 %s159_s26, 4  ;;  %s167_s27 = sshll.u32 %s165_s20, 4  ;;  %s170_s19 = int_to_ptr.vmem [resolvable:$true] %s169_s19  ;;  %s168_s27 = int_to_ptr.hbm [resolvable:$true] %s167_s27 }
  0x1d   : > { %s156_s28 = scalar_lea.sflag [#allocation7], %s133_s25  ;;  %178 = sbr.rel (%p175_p3) target bundleno = 322 (0x142), region = 28 }
  0x1e   : > { %503 = dma.hbm_to_vmem [thread:$0]  (!%p796_p0), %s168_s27, 32, %s170_s19, %s156_s28  }
  0x1f   : > { %s811_s29 = sand.u32 (!%p175_p3), 1, %s692_s10  }
  0x20   : > { %s484_s30 = sshll.u32 (!%p175_p3), %s811_s29, 3  ;;  %s181_s3 = scalar_lea.sflag (!%p175_p3), [#allocation4], %s811_s29 }
  0x21   : > { %s184_s4 = scalar_lea.vmem (!%p175_p3), [#allocation3], %s484_s30 }
  0x22   : > { %675 = dma.done.wait (%p772_p8), %s181_s3, 128  }
  0x23   : > { %677 = vsyncadd (%p772_p8), %s181_s3, 4294967168  ;;  %s485_s25 = sshll.u32 %s811_s29, 1  ;;  %s191_s5 = scalar_lea.sflag [#allocation7], %s811_s29 }
  0x24   : > { %s821_s6 = scalar_lea.vmem [#allocation6], %s485_s25 }
  0x25   : > { %679 = dma.done.wait (%p772_p8), %s191_s5, 32  }
  0x26   : > { %681 = vsyncadd (%p772_p8), %s191_s5, 4294967264  ;;  %v227_v0 = vld [vmem:[%s184_s4] sm:$0xff]  ;;  %vm235_vm0 = vcmask 1043456   ;;  %v298_v50 = vlaneseq  ;;  %v228_v51 = vld [vmem:[%s821_s6] sm:$0x3]  ;;  %s368_s8 = scalar_lea.hbm %s878_s2, %s700_s12  ;;  %s219_s15 = scalar_lea.vmem [#allocation8], %s811_s29 }
  0x27   : > { %230 = vst [vmem:[#allocation1] ss:$2 sm:$0xff] %v227_v0  ;;  %v307_v54 = vperm.slane %v228_v51, 0  ;;  %v308_v55 = vperm.slane %v228_v51, 1  ;;  %s370_s16 = sshll.u32 %s219_s15, 4  ;;  %s372_s18 = sshll.u32 %s368_s8, 4  ;;  %s371_s16 = int_to_ptr.vmem [resolvable:$true] %s370_s16  ;;  %s373_s18 = int_to_ptr.hbm [resolvable:$true] %s372_s18 }
  0x28   : > { %v299_v53 = vshrl.u32 %v298_v50, 7  ;;  %s360_s26 = scalar_lea.sflag [#allocation5], %s811_s29  ;;  %s636_s19 = sshra.s32 %s373_s18, 4  ;;  %s637_s19 = int_to_ptr.hbm [resolvable:$true] %s636_s19 }
  0x29   : > { %s638_s27 = scalar_lea.hbm %s637_s19, 1  ;;  %s642_s12 = scalar_lea.hbm %s878_s2, 2 }
  0x2a   : > { %vm309_vm5 = vcmp.eq.s32.totalorder %v299_v53, %v307_v54  ;;  %vm310_vm6 = vcmp.eq.s32.totalorder %v299_v53, %v308_v55  ;;  %p639_p4 = scmp.ne.s32.totalorder %s637_s19, %s638_s27  ;;  %p643_p7 = scmp.lt.s32.totalorder %s637_s19, %s878_s2 }
  0x2b   : > { %p644_p8 = scmp.lt.s32.totalorder %s642_s12, %s638_s27 }
  0x2c   : > { %p640_p5 = pnand %p639_p4, %p776_p9 }
  0x2d   : > { %p645_p10 = por %p644_p8, %p643_p7 }
  0x2e   : > { %v231_v1 = vld.sshfl [vmem:[#allocation1] sm:$0xff pattern:$0x75316420]  ;;  %v232_v2 = vld.sshfl [vmem:[#allocation1 + $0x8] sm:$0xff pattern:$0x75316420]  ;;  %p641_p6 = pneg %p640_p5 }
  0x2f   : > { %v236_v3 = vsel %vm235_vm0, %v231_v1, -inf  ;;  %v243_v4 = vsel %vm235_vm0, %v232_v2, -inf }
  0x30   : > { %v237_v5 = vrot.slane %v236_v3, 4  ;;  %v244_v6 = vrot.slane %v243_v4, 4  ;;  %p646_p13 = pnand %p645_p10, %p641_p6 }
  0x32   : > { %v238_v7 = vmax.f32 %v236_v3, %v237_v5  ;;  %v245_v8 = vmax.f32 %v243_v4, %v244_v6 }
  0x34   : > { %v239_v9 = vrot.slane %v238_v7, 2  ;;  %v246_v10 = vrot.slane %v245_v8, 2 }
  0x36   : > { %v240_v11 = vmax.f32 %v238_v7, %v239_v9  ;;  %v247_v12 = vmax.f32 %v245_v8, %v246_v10 }
  0x38   : > { %v241_v13 = vrot.slane %v240_v11, 1  ;;  %v248_v14 = vrot.slane %v247_v12, 1 }
  0x3a   : > { %v242_v15 = vmax.f32 %v240_v11, %v241_v13  ;;  %v249_v16 = vmax.f32 %v247_v12, %v248_v14 }
  0x3c   : > { %v252_v17 = vrot.slane %v249_v16, 4 }
  0x3e   : > { %v253_v18 = vsel %vm235_vm0, %v242_v15, %v252_v17 }
  0x3f   : > { %v255_v19 = vsub.f32 %v227_v0, %v253_v18 }
  0x41   : > { %v256_v20 = vmul.f32 1.442695, %v255_v19 }
  0x43   : > { %558 = vpow2.f32 %v256_v20 }
  0x49   : > { %v559_v21 = vpop.eup %558 }
  0x4a   : > { %259 = vst [vmem:[#allocation1] ss:$2 sm:$0xff] %v559_v21 }
  0x51   : > { %v260_v22 = vld.sshfl [vmem:[#allocation1] sm:$0xff pattern:$0x75316420]  ;;  %v261_v23 = vld.sshfl [vmem:[#allocation1 + $0x8] sm:$0xff pattern:$0x75316420] }
  0x52   : > { %v264_v24 = vsel %vm235_vm0, %v260_v22, 0.0  ;;  %v271_v25 = vsel %vm235_vm0, %v261_v23, 0.0 }
  0x53   : > { %v265_v26 = vrot.slane %v264_v24, 4  ;;  %v272_v27 = vrot.slane %v271_v25, 4 }
  0x55   : > { %v266_v28 = vadd.f32 %v265_v26, %v264_v24  ;;  %v273_v29 = vadd.f32 %v272_v27, %v271_v25 }
  0x57   : > { %v267_v30 = vrot.slane %v266_v28, 2  ;;  %v274_v31 = vrot.slane %v273_v29, 2 }
  0x59   : > { %v268_v32 = vadd.f32 %v267_v30, %v266_v28  ;;  %v275_v33 = vadd.f32 %v274_v31, %v273_v29 }
  0x5b   : > { %v269_v34 = vrot.slane %v268_v32, 1  ;;  %v276_v35 = vrot.slane %v275_v33, 1 }
  0x5d   : > { %v270_v36 = vadd.f32 %v269_v34, %v268_v32  ;;  %v277_v37 = vadd.f32 %v276_v35, %v275_v33 }
  0x5f   : > { %v280_v38 = vrot.slane %v277_v37, 4 }
  0x61   : > { %v281_v39 = vsel %vm235_vm0, %v270_v36, %v280_v38 }
  0x62   : > { %560 = vrcp.f32 %v281_v39  ;;  %v294_v42 = vand.u32 2147483648, %v281_v39  ;;  %vm288_vm1 = vweird.f32 %v281_v39  ;;  %v292_v44 = vand.u32 2147483647, %v281_v39 }
  0x64   : > { %v295_v46 = vor.u32 1.1754944e-38, %v294_v42  ;;  %vm293_vm4 = vcmp.eq.f32.partialorder %v292_v44, 8.507059e+37 }
  0x68   : > { %v561_v40 = vpop.eup %560 }
  0x69   : > { %v284_v41 = vmul.f32 %v561_v40, %v281_v39  ;;  %vm289_vm2 = vweird.f32 %v561_v40 }
  0x6a   : > { %vm290_vm3 = vmor %vm288_vm1, %vm289_vm2 }
  0x6b   : > { %v285_v43 = vsub.f32 1.0, %v284_v41 }
  0x6d   : > { %v286_v45 = vmul.f32 %v561_v40, %v285_v43 }
  0x6f   : > { %v287_v47 = vadd.f32 %v561_v40, %v286_v45 }
  0x71   : > { %v291_v48 = vsel %vm290_vm3, %v561_v40, %v287_v47 }
  0x72   : > { %v296_v49 = vsel %vm293_vm4, %v295_v46, %v291_v48 }
  0x73   : > { %v297_v52 = vmul.f32 %v559_v21, %v296_v49 }
  0x75   : > { %321 = vst [vmem:[#allocation1] ss:$2 sm:$0xff] %v297_v52 }
  0x7c   : > { %v322_v56 = vld.sshfl [vmem:[#allocation1] sm:$0xff pattern:$0x75316420]  ;;  %v323_v57 = vld.sshfl [vmem:[#allocation1 + $0x8] sm:$0xff pattern:$0x75316420] }
  0x7d   : > { %v326_v58 = vsel %vm309_vm5, %v322_v56, 0.0  ;;  %v327_v59 = vsel %vm310_vm6, %v323_v57, 0.0 }
  0x7e   : > { %v330_v60 = vrot.slane %v327_v59, 4 }
  0x80   : > { %v331_v61 = vsel %vm235_vm0, %v326_v58, %v330_v60 }
  0x81   : > { %340 = vst [vmem:[#allocation1] ss:$2 sm:$0xff] %v331_v61 }
  0x88   : > { %v341_v62 = vld.sshfl [vmem:[#allocation1] sm:$0xff pattern:$0x75316420]  ;;  %v342_v63 = vld.sshfl [vmem:[#allocation1 + $0x8] sm:$0xff pattern:$0x75316420] }
  0x89   : > { %v345_v0 = vsel %vm235_vm0, %v341_v62, 0.0  ;;  %v346_v1 = vsel %vm235_vm0, %v342_v63, 0.0 }
  0x8a   : > { %v347_v2 = vadd.f32 %v346_v1, %v345_v0 }
  0x8c   : > { %348 = vadd.xlane.f32.xlu0 %v347_v2 }
  0xff   : > { %v349_v3 = vpop.xlane.xlu0 %348 }
 0x100   : > { %v350_v4 = vrot.slane %v349_v3, 4 }
 0x102   : > { %v351_v5 = vadd.f32 %v350_v4, %v349_v3 }
 0x104   : > { %v352_v6 = vrot.slane %v351_v5, 2 }
 0x106   : > { %v353_v7 = vadd.f32 %v352_v6, %v351_v5 }
 0x108   : > { %v354_v8 = vrot.slane %v353_v7, 1 }
 0x10a   : > { %v355_v9 = vadd.f32 %v354_v8, %v353_v7 }
 0x10c   : > { %489 = vpush %v355_v9 }
 0x13d   : > { %s490_s20 = spop %489 }
 0x13e   : > { %v357_v10 = vstv %s490_s20 }
 0x13f   : > { %358 = vst [vmem:[%s219_s15] sm:$0x1] %v357_v10 }
 0x140   : > { %649 = shalt.err (!%p646_p13)
}
 0x141   : > { %495 = dma.vmem_to_hbm [thread:$0]  (%p776_p9), %s371_s16, 16, %s373_s18, %s360_s26  }
 0x142 PF: > { %s384_s29 = sand.u32 1, %s688_s9   ;;  %p505_p0 = pnand %p477_p12, %p783_p11 }
 0x143   : > { %s385_s25 = scalar_lea.sflag [#allocation5], %s384_s29 }
 0x144   : > { %p506_p1 = pneg %p505_p0 }
 0x146   : > { %683 = dma.done.wait (%p506_p1), %s385_s25, 16  }
 0x147   : > { %685 = vsyncadd (%p506_p1), %s385_s25, 4294967280  ;;  %s21_s14 = sadd.s32 1, %s708_s14   ;;  %s884_s9 = smov %s692_s10 }
 0x148   : > { %p18_p2 = scmp.ge.s32.totalorder %s21_s14, 4   ;;  %s885_s10 = smov %s696_s11 }
 0x149   : > { %s886_s11 = smov %s781_s23  ;;  %s887_s12 = smov %s704_s13 }
 0x14a   : > { %s888_s13 = smov %s890_s17  ;;  %20 = sbr.rel (!%p18_p2) target bundleno = 8 (0x8), region = 94 }
 0x14f   :  { %390 = vsyncpa [#allocation4], 1 }
 0x150   :  { %392 = vsyncpa [#allocation4 + $0x1], 1 }
 0x151   :  { %393 = vsyncpa [#allocation7], 1 }
 0x152   :  { %395 = vsyncpa [#allocation7 + $0x1], 1 }
 0x153   :  { %396 = vsyncpa [#allocation5], 1 }
 0x154   :  { %398 = vsyncpa [#allocation5 + $0x1], 1 }

</bundles_post_ra>
